<compile_context>
chip_gen: v6e
topology: v6e:2x2x1
jax: 0.10.0
libtpu: 0.0.40
codegen_flags: <defaults>
</compile_context>

<pallas_src>
import functools

import jax
import jax.numpy as jnp
from jax.experimental import pallas as pl
from jax.experimental.pallas import tpu as pltpu


# ---------------------------------------------------------------------------
# Kernel 1: sequence-invariant precompute (adjacency, Chebyshev supports,
# per-node biases).  Run ONCE per sequence / training step, not per timestep.
# ---------------------------------------------------------------------------
def precompute_kernel(emb_ref, gb_ref, ub_ref, supp_ref, bg_ref, bu_ref,
                      *, cheb_k):
    E = emb_ref[...]                                             # (N, D) f32
    N = E.shape[0]

    # Adaptive adjacency: softmax(relu(E @ E^T), axis=1).  Exact divide.
    A = jax.lax.dot_general(E, E, (((1,), (1,)), ((), ())),
                            preferred_element_type=jnp.float32)  # (N, N)
    A = jnp.maximum(A, 0.0)
    A = jnp.exp(A - jnp.max(A, axis=-1, keepdims=True))
    A = A / jnp.sum(A, axis=-1, keepdims=True)

    # Chebyshev supports T_1 .. T_{cheb_k-1}; T_0 = I is handled implicitly in
    # the cell kernel (no identity matmul is ever issued).  Kept in f32.
    supp_ref[0] = A
    if cheb_k > 2:
        row = jax.lax.broadcasted_iota(jnp.int32, (N, N), 0)
        col = jax.lax.broadcasted_iota(jnp.int32, (N, N), 1)
        t_prev = (row == col).astype(jnp.float32)                # T_0 = I
        t_cur = A
        for k in range(2, cheb_k):
            t_next = 2.0 * jnp.dot(A, t_cur,
                                   preferred_element_type=jnp.float32) - t_prev
            supp_ref[k - 1] = t_next
            t_prev, t_cur = t_cur, t_next

    # Per-node biases (batch invariant): E @ bias_pool.
    bg_ref[...] = jnp.dot(E, gb_ref[...], preferred_element_type=jnp.float32)
    bu_ref[...] = jnp.dot(E, ub_ref[...], preferred_element_type=jnp.float32)


# ---------------------------------------------------------------------------
# Kernel 2: the GRU cell body, Bt batch elements per grid step.
# ---------------------------------------------------------------------------
def gcrn_cell_kernel(cat_ref, supp_ref, wbig_ref, wus_ref,
                     eg_ref, eu_ref, gg_ref, gu_ref, bg_ref, bu_ref,
                     h_ref, *, cheb_k, hidden, dim_in, matmul_dtype):
    f32 = jnp.float32
    md = matmul_dtype
    H = hidden
    Din = dim_in
    Bt, N, Ci = cat_ref.shape
    R = Bt * N                                   # flattened row count

    cat3 = cat_ref[...]                          # (Bt, N, Ci) f32
    cat = cat3.reshape(R, Ci)
    s = cat[:, Din:]                             # state slice, (R, H)

    def spread(v3):
        # [v, T_1 v, ..., T_{K-1} v], each flattened to (R, C).
        # T_0 = I -> no matmul issued for k=0.  The (N,N) supports apply per
        # batch element, so the spread is a static per-b unroll.
        C = v3.shape[-1]
        outs = [v3.reshape(R, C)]
        for k in range(cheb_k - 1):
            parts = [jnp.dot(supp_ref[k], v3[b], preferred_element_type=f32)
                     for b in range(Bt)]
            outs.append(jnp.concatenate(parts, axis=0))
        return outs

    def combine(y, eexp, g, bias):
        # out = bias + sum_d E[:, d] * y[:, d*Co:(d+1)*Co], done as ONE aligned
        # VPU multiply (Eexp has E[:, d] tiled across its Co-lane block) plus
        # an MXU reduction with the constant block-identity matrix g.
        dco = y.shape[-1]
        y = (y.reshape(Bt, N, dco) * eexp[None]).reshape(R, dco)
        red = jnp.dot(y, g, preferred_element_type=f32)          # (R, Co)
        co = red.shape[-1]
        return (red.reshape(Bt, N, co) + bias[None]).reshape(R, co)

    # Spread of cat(x, state); shared by the gate AGCN (full Ci contraction)
    # and by the x-side of the update AGCN (its weights are zero-padded on the
    # state rows and merged into wbig's trailing columns).
    sp_cat = spread(cat3)

    d2h = eg_ref.shape[-1]                       # D * 2H  (gate column block)

    ybig = jnp.dot(sp_cat[0].astype(md), wbig_ref[0],
                   preferred_element_type=f32)
    for k in range(1, cheb_k):
        ybig = ybig + jnp.dot(sp_cat[k].astype(md), wbig_ref[k],
                              preferred_element_type=f32)        # (R, D*3H)

    # Gate: sigmoid -> (z, r)
    zr = jax.nn.sigmoid(
        combine(ybig[:, :d2h], eg_ref[...], gg_ref[...], bg_ref[...]))
    z = zr[:, :H]
    r = zr[:, H:]

    # Update AGCN: x-side already sits in ybig[:, d2h:]; add the z*state side.
    sp_zs = spread((z * s).reshape(Bt, N, H))
    yu = ybig[:, d2h:]                           # (R, D*H)
    for k in range(cheb_k):
        yu = yu + jnp.dot(sp_zs[k].astype(md), wus_ref[k],
                          preferred_element_type=f32)
    hc = jnp.tanh(combine(yu, eu_ref[...], gu_ref[...], bu_ref[...]))

    h = r * s + (1.0 - r) * hc                   # (R, H)
    h_ref[...] = h.reshape(Bt, N, H)


# ---------------------------------------------------------------------------
# Wrappers
# ---------------------------------------------------------------------------
def gcrn_precompute(node_embeddings, gate_w, gate_b, upd_w, upd_b, cheb_k,
                    dim_in, *, matmul_dtype=jnp.bfloat16):
    """Everything that depends only on parameters: compute once per sequence."""
    N, D = node_embeddings.shape
    K = cheb_k
    Dw, Kw, Ci, Co_g = gate_w.shape
    Co_u = upd_w.shape[-1]
    H = Co_u
    assert K >= 2 and Kw == K and Dw == D
    assert Co_g == 2 * H and Ci == dim_in + H

    supp, bg, bu = pl.pallas_call(
        functools.partial(precompute_kernel, cheb_k=K),
        out_shape=(jax.ShapeDtypeStruct((K - 1, N, N), jnp.float32),
                   jax.ShapeDtypeStruct((N, Co_g), jnp.float32),
                   jax.ShapeDtypeStruct((N, Co_u), jnp.float32)),
    )(node_embeddings, gate_b, upd_b)

    # (D, K, Ci, Co) -> (K, Ci, D*Co): fuse the embedding dim into the lanes.
    def fuse(w):
        d_, k_, ci_, co_ = w.shape
        return jnp.transpose(w, (1, 2, 0, 3)).reshape(k_, ci_, d_ * co_)

    wg = fuse(gate_w)                            # (K, Ci,  D*2H)
    wu = fuse(upd_w)                             # (K, Ci,  D*H)
    wux = wu[:, :dim_in, :]                      # (K, Din, D*H)
    wus = wu[:, dim_in:, :]                      # (K, H,   D*H)
    # Merge the update AGCN's x-side into the gate matmul (zero on state rows).
    wux_pad = jnp.concatenate(
        [wux, jnp.zeros((K, H, D * Co_u), wu.dtype)], axis=1)    # (K, Ci, D*H)
    w_big = jnp.concatenate([wg, wux_pad], axis=-1).astype(matmul_dtype)
    w_us = wus.astype(matmul_dtype)

    # Expanded embeddings (E[:, d] tiled across each Co-lane block) and the
    # block-identity reducers used by the kernel's E-combine.
    eexp_g = jnp.repeat(node_embeddings, Co_g, axis=1)           # (N, D*2H)
    eexp_u = jnp.repeat(node_embeddings, Co_u, axis=1)           # (N, D*H)
    g_g = jnp.tile(jnp.eye(Co_g, dtype=jnp.float32), (D, 1))     # (D*2H, 2H)
    g_u = jnp.tile(jnp.eye(Co_u, dtype=jnp.float32), (D, 1))     # (D*H,  H)

    return dict(supp=supp, bg=bg, bu=bu, w_big=w_big, w_us=w_us,
                eexp_g=eexp_g, eexp_u=eexp_u, g_g=g_g, g_u=g_u,
                cheb_k=K, dim_in=dim_in, hidden=H, matmul_dtype=matmul_dtype)


def _pick_block_b(B, block_b=None):
    if block_b is not None:
        if B % block_b != 0:
            raise ValueError(f"block_b={block_b} must divide batch {B}")
        return block_b
    # Prefer >= 2 grid steps (keeps both v7x TensorCores busy) while taking the
    # largest batch tile <= 16 to amortize per-grid-step overhead.
    cands = [d for d in range(1, min(B, 16) + 1) if B % d == 0]
    multi = [d for d in cands if B // d >= 2]
    return max(multi) if multi else max(cands)


def gcrn_cell(x, state, pre, *, block_b=None, vmem_limit_bytes=None):
    """One GRU step.  `pre` is the output of gcrn_precompute (hoisted)."""
    B, N, Din = x.shape
    H = pre["hidden"]
    K = pre["cheb_k"]
    assert Din == pre["dim_in"] and state.shape == (B, N, H)
    Ci = Din + H
    md = pre["matmul_dtype"]

    bt = _pick_block_b(B, block_b)
    grid = (B // bt,)

    # cat(x, state) built once in XLA; the kernel recovers state as a lane
    # slice, so no second per-step input stream is needed.
    cat = jnp.concatenate([x.astype(jnp.float32), state.astype(jnp.float32)],
                          axis=-1)                               # (B, N, Ci)

    d3h = pre["w_big"].shape[-1]
    d2h = pre["eexp_g"].shape[-1]
    dh = pre["eexp_u"].shape[-1]

    per_g = lambda g: (g, 0, 0)
    inv2 = lambda g: (0, 0)
    inv3 = lambda g: (0, 0, 0)

    kernel = functools.partial(gcrn_cell_kernel, cheb_k=K, hidden=H,
                               dim_in=Din, matmul_dtype=md)
    # Note (v5e, large N): the grid-invariant supports/weights are small here,
    # but for N >~ 1000 with cheb_k > 2 raise vmem_limit_bytes (or single-buffer
    # the invariant specs) to stay inside the 16 MiB scoped-VMEM default.
    return pl.pallas_call(
        kernel,
        out_shape=jax.ShapeDtypeStruct((B, N, H), jnp.float32),
        grid=grid,
        in_specs=[
            pl.BlockSpec((bt, N, Ci), per_g),        # cat(x, state) per step
            pl.BlockSpec((K - 1, N, N), inv3),       # Chebyshev supports (f32)
            pl.BlockSpec((K, Ci, d3h), inv3),        # gate + update-x weights
            pl.BlockSpec((K, H, dh), inv3),          # update state-side weights
            pl.BlockSpec((N, d2h), inv2),            # Eexp (gate)
            pl.BlockSpec((N, dh), inv2),             # Eexp (update)
            pl.BlockSpec((d2h, 2 * H), inv2),        # block-identity G (gate)
            pl.BlockSpec((dh, H), inv2),             # block-identity G (update)
            pl.BlockSpec((N, 2 * H), inv2),          # gate bias (E @ pool)
            pl.BlockSpec((N, H), inv2),              # update bias
        ],
        out_specs=pl.BlockSpec((bt, N, H), per_g),
        compiler_params=pltpu.CompilerParams(
            dimension_semantics=("parallel",),
            vmem_limit_bytes=vmem_limit_bytes),
    )(cat, pre["supp"], pre["w_big"], pre["w_us"], pre["eexp_g"],
      pre["eexp_u"], pre["g_g"], pre["g_u"], pre["bg"], pre["bu"])


def gcrn_cell_forward(x, state, node_embeddings, gate_w, gate_b, upd_w, upd_b,
                      cheb_k, *, matmul_dtype=jnp.bfloat16, block_b=None):
    """Module-equivalent one-shot API (precompute + cell)."""
    pre = gcrn_precompute(node_embeddings, gate_w, gate_b, upd_w, upd_b,
                          cheb_k, x.shape[-1], matmul_dtype=matmul_dtype)
    return gcrn_cell(x, state, pre, block_b=block_b)


# ---------------- pure-JAX reference (mirrors the PyTorch code) ------------
def _agcn_ref(x, E, wpool, bpool, cheb_k):
    N = E.shape[0]
    supports = jax.nn.softmax(jnp.maximum(E @ E.T, 0.0), axis=1)
    ss = [jnp.eye(N, dtype=x.dtype), supports]
    for _ in range(2, cheb_k):
        ss.append(2.0 * supports @ ss[-1] - ss[-2])
    S = jnp.stack(ss, 0)
    weights = jnp.einsum('nd,dkio->nkio', E, wpool)
    bias = E @ bpool
    x_g = jnp.einsum('knm,bmc->bknc', S, x)
    x_g = jnp.transpose(x_g, (0, 2, 1, 3))
    return jnp.einsum('bnki,nkio->bno', x_g, weights) + bias


def _gcrn_ref(x, state, E, gw, gb, uw, ub, cheb_k, H):
    cat = jnp.concatenate([x, state], axis=-1)
    zr = jax.nn.sigmoid(_agcn_ref(cat, E, gw, gb, cheb_k))
    z, r = zr[..., :H], zr[..., H:]
    cand = jnp.concatenate([x, z * state], axis=-1)
    hc = jnp.tanh(_agcn_ref(cand, E, uw, ub, cheb_k))
    return r * state + (1.0 - r) * hc


if __name__ == "__main__":
    B, N, Din, H, cheb_k, D = 2, 16, 4, 32, 3, 8
    T = 3
    Ci = Din + H

    key = jax.random.PRNGKey(0)
    ks = jax.random.split(key, 7)
    xs = jax.random.normal(ks[0], (T, B, N, Din), jnp.float32)
    state0 = jax.random.normal(ks[1], (B, N, H), jnp.float32) * 0.1
    node_emb = jax.random.normal(ks[2], (N, D), jnp.float32) * 0.5
    gate_w = jax.random.normal(ks[3], (D, cheb_k, Ci, 2 * H), jnp.float32) * 0.1
    gate_b = jax.random.normal(ks[4], (D, 2 * H), jnp.float32) * 0.1
    upd_w = jax.random.normal(ks[5], (D, cheb_k, Ci, H), jnp.float32) * 0.1
    upd_b = jax.random.normal(ks[6], (D, H), jnp.float32) * 0.1

    # Exact (f32) path: precompute hoisted once, rolled over T timesteps with
    # block_b=B (exercises the flattened Bt>1 path, grid=(1,)).
    pre32 = gcrn_precompute(node_emb, gate_w, gate_b, upd_w, upd_b, cheb_k,
                            Din, matmul_dtype=jnp.float32)
    h, h_ref = state0, state0
    for t in range(T):
        h = gcrn_cell(xs[t], h, pre32, block_b=B)
        h_ref = _gcrn_ref(xs[t], h_ref, node_emb, gate_w, gate_b, upd_w,
                          upd_b, cheb_k, H)
    h = jax.block_until_ready(h)
    assert h.shape == (B, N, H)
    err32 = float(jnp.max(jnp.abs(h - h_ref)))
    assert err32 < 2e-3, err32

    # Default fast path: bf16 MXU operands, default batch tiling (grid of 2).
    pre16 = gcrn_precompute(node_emb, gate_w, gate_b, upd_w, upd_b, cheb_k, Din)
    h16 = jax.block_until_ready(gcrn_cell(xs[0], state0, pre16))
    ref1 = _gcrn_ref(xs[0], state0, node_emb, gate_w, gate_b, upd_w, upd_b,
                     cheb_k, H)
    err16 = float(jnp.max(jnp.abs(h16 - ref1)))
    assert err16 < 1e-1, err16

    # Module-equivalent one-shot wrapper.
    h_once = jax.block_until_ready(
        gcrn_cell_forward(xs[0], state0, node_emb, gate_w, gate_b, upd_w,
                          upd_b, cheb_k, matmul_dtype=jnp.float32))
    err_once = float(jnp.max(jnp.abs(h_once - ref1)))
    assert err_once < 1e-3, err_once

    print("KERNEL_OK")
</pallas_src>

<mosaic_0001>
module attributes {stable_mosaic.version = 11 : i64} {
  func.func @precompute_kernel(%arg0: memref<16x8xf32, #tpu.memory_space<vmem>>, %arg1: memref<8x64xf32, #tpu.memory_space<vmem>>, %arg2: memref<8x32xf32, #tpu.memory_space<vmem>>, %arg3: memref<2x16x16xf32, #tpu.memory_space<vmem>>, %arg4: memref<16x64xf32, #tpu.memory_space<vmem>>, %arg5: memref<16x32xf32, #tpu.memory_space<vmem>>) attributes {dimension_semantics = [], scalar_prefetch = 0 : i64, scratch_operands = 0 : i64, tpu.core_type = #tpu.core_type<tc>} {
    %c0 = arith.constant 0 : index
    %c0_0 = arith.constant 0 : index
    %0 = vector.load %arg0[%c0, %c0_0] : memref<16x8xf32, #tpu.memory_space<vmem>>, vector<16x8xf32>
    %cst = arith.constant dense<0.000000e+00> : vector<16x16xf32>
    %1 = tpu.matmul %0, %0, %cst {dimension_numbers = #tpu.dot_dimension_numbers<[1], [1], [0], [0], [0, 0, 1, 0], [], []>} : vector<16x8xf32>, vector<16x8xf32>, vector<16x16xf32> -> vector<16x16xf32>
    %cst_1 = arith.constant 0.000000e+00 : f32
    %2 = vector.broadcast %cst_1 : f32 to vector<16x16xf32>
    %3 = arith.maximumf %1, %2 : vector<16x16xf32>
    %cst_2 = arith.constant dense<0xFF800000> : vector<16xf32>
    %4 = vector.multi_reduction <maximumf>, %3, %cst_2 [1] : vector<16x16xf32> to vector<16xf32>
    %5 = vector.shape_cast %4 : vector<16xf32> to vector<16x1xf32>
    %6 = vector.broadcast %5 : vector<16x1xf32> to vector<16x16xf32>
    %7 = arith.subf %3, %6 : vector<16x16xf32>
    %8 = math.exp %7 : vector<16x16xf32>
    %cst_3 = arith.constant dense<0.000000e+00> : vector<16xf32>
    %9 = vector.multi_reduction <add>, %8, %cst_3 [1] : vector<16x16xf32> to vector<16xf32>
    %10 = vector.shape_cast %9 : vector<16xf32> to vector<16x1xf32>
    %11 = vector.broadcast %10 : vector<16x1xf32> to vector<16x16xf32>
    %12 = arith.divf %8, %11 : vector<16x16xf32>
    %c0_4 = arith.constant 0 : index
    %c0_5 = arith.constant 0 : index
    %c0_6 = arith.constant 0 : index
    %13 = vector.load %arg3[%c0_4, %c0_5, %c0_6] : memref<2x16x16xf32, #tpu.memory_space<vmem>>, vector<1x16x16xf32>
    %14 = vector.shape_cast %13 : vector<1x16x16xf32> to vector<16x16xf32>
    %15 = vector.shape_cast %12 : vector<16x16xf32> to vector<1x16x16xf32>
    tpu.vector_store %arg3[%c0_4, %c0_5, %c0_6], %15 {strides = array<i32>} : memref<2x16x16xf32, #tpu.memory_space<vmem>>, vector<1x16x16xf32>,
    %16 = tpu.iota {dimensions = array<i32: 0>} : vector<16x16xi32>
    %17 = tpu.iota {dimensions = array<i32: 1>} : vector<16x16xi32>
    %18 = arith.cmpi eq, %16, %17 : vector<16x16xi32>
    %19 = arith.extui %18 : vector<16x16xi1> to vector<16x16xi32>
    %20 = arith.sitofp %19 : vector<16x16xi32> to vector<16x16xf32>
    %cst_7 = arith.constant dense<0.000000e+00> : vector<16x16xf32>
    %21 = tpu.matmul %12, %12, %cst_7 {dimension_numbers = #tpu.dot_dimension_numbers<[1], [0], [0], [1], [0, 0, 1, 1], [], []>} : vector<16x16xf32>, vector<16x16xf32>, vector<16x16xf32> -> vector<16x16xf32>
    %cst_8 = arith.constant 2.000000e+00 : f32
    %22 = vector.broadcast %cst_8 : f32 to vector<16x16xf32>
    %23 = arith.mulf %22, %21 : vector<16x16xf32>
    %24 = arith.subf %23, %20 : vector<16x16xf32>
    %c1 = arith.constant 1 : index
    %c0_9 = arith.constant 0 : index
    %c0_10 = arith.constant 0 : index
    %25 = vector.load %arg3[%c1, %c0_9, %c0_10] : memref<2x16x16xf32, #tpu.memory_space<vmem>>, vector<1x16x16xf32>
    %26 = vector.shape_cast %25 : vector<1x16x16xf32> to vector<16x16xf32>
    %27 = vector.shape_cast %24 : vector<16x16xf32> to vector<1x16x16xf32>
    tpu.vector_store %arg3[%c1, %c0_9, %c0_10], %27 {strides = array<i32>} : memref<2x16x16xf32, #tpu.memory_space<vmem>>, vector<1x16x16xf32>,
    %c0_11 = arith.constant 0 : index
    %c0_12 = arith.constant 0 : index
    %28 = vector.load %arg1[%c0_11, %c0_12] : memref<8x64xf32, #tpu.memory_space<vmem>>, vector<8x64xf32>
    %cst_13 = arith.constant dense<0.000000e+00> : vector<16x64xf32>
    %29 = tpu.matmul %0, %28, %cst_13 {dimension_numbers = #tpu.dot_dimension_numbers<[1], [0], [0], [1], [0, 0, 1, 1], [], []>} : vector<16x8xf32>, vector<8x64xf32>, vector<16x64xf32> -> vector<16x64xf32>
    %c0_14 = arith.constant 0 : index
    %c0_15 = arith.constant 0 : index
    %30 = vector.load %arg4[%c0_14, %c0_15] : memref<16x64xf32, #tpu.memory_space<vmem>>, vector<16x64xf32>
    tpu.vector_store %arg4[%c0_14, %c0_15], %29 {strides = array<i32>} : memref<16x64xf32, #tpu.memory_space<vmem>>, vector<16x64xf32>,
    %c0_16 = arith.constant 0 : index
    %c0_17 = arith.constant 0 : index
    %31 = vector.load %arg2[%c0_16, %c0_17] : memref<8x32xf32, #tpu.memory_space<vmem>>, vector<8x32xf32>
    %cst_18 = arith.constant dense<0.000000e+00> : vector<16x32xf32>
    %32 = tpu.matmul %0, %31, %cst_18 {dimension_numbers = #tpu.dot_dimension_numbers<[1], [0], [0], [1], [0, 0, 1, 1], [], []>} : vector<16x8xf32>, vector<8x32xf32>, vector<16x32xf32> -> vector<16x32xf32>
    %c0_19 = arith.constant 0 : index
    %c0_20 = arith.constant 0 : index
    %33 = vector.load %arg5[%c0_19, %c0_20] : memref<16x32xf32, #tpu.memory_space<vmem>>, vector<16x32xf32>
    tpu.vector_store %arg5[%c0_19, %c0_20], %32 {strides = array<i32>} : memref<16x32xf32, #tpu.memory_space<vmem>>, vector<16x32xf32>,
    return
  }
}

</mosaic_0001>

<bundles_post_ra>
// kernel: tpu_custom_call.1
= control target key start
LH: loop header
LB: loop body
LE: loop exit
PB: predicated region body
PF: predicated region fallthrough
CT: control target
= control target key end

     0   :  { %11 = vsyncpa [#allocation3], 0  ;;  %vm21_vm0 = vcmask 64512   ;;  %s648_s0 = inlined_call_operand.vmem [shape: f32[16,8], index: 0, kind: input, shape index: {}]   ;;  %s649_s1 = inlined_call_operand.vmem [shape: f32[8,64], index: 1, kind: input, shape index: {}]   ;;  %s650_s2 = inlined_call_operand.vmem [shape: f32[8,32], index: 2, kind: input, shape index: {}]   ;;  %s651_s3 = inlined_call_operand.hbm [shape: f32[2,16,16], index: 3, kind: output, shape index: {0}]   ;;  %s652_s4 = inlined_call_operand.hbm [shape: f32[16,64], index: 4, kind: output, shape index: {1}]   ;;  %s653_s5 = inlined_call_operand.hbm [shape: f32[16,32], index: 5, kind: output, shape index: {2}]  }
   0x1   :  { %v20_v0 = vld [vmem:[%s648_s0 + $0x8] sm:$0xff]  ;;  %v19_v1 = vld [vmem:[%s648_s0] sm:$0xff] }
   0x2   :  { %12 = vsyncpa [#allocation5], 0  ;;  %460 = vmatprep.subr.msk.mxu0 %vm21_vm0, %v20_v0  ;;  %464 = vmatprep.mubr.msk.f32.mxu0 %vm21_vm0, %v19_v1  ;;  %vm105_vm1 = vcmask 130048   ;;  %v308_v18 = vld [vmem:[%s650_s2] sm:$0xff]  ;;  %vm384_vm2 = vcmask 261120   ;;  %v130_v28 = vlaneseq  ;;  %v562_v32 = vmov 0.0  }
   0x3   :  { %461 = vmatpush3.xpose.msk.msra.mxu0 %vm21_vm0, %v20_v0  ;;  %v229_v25 = vld [vmem:[%s649_s1] sm:$0xff]  ;;  %vm305_vm5 = vcmask 523264   ;;  %s563_s1 = smov [#allocation4]   ;;  %s564_s25 = smov [#allocation2]  }
   0x4   :  { %462 = vmatprep.subr.msk.mxu0 %vm21_vm0, %v19_v1  ;;  %v131_v29 = vshrl.u32 %v130_v28, 7  ;;  %v134_v31 = vand.u32 127, %v130_v28  ;;  %s404_s2 = sshll.u32 %s563_s1, 4  ;;  %s392_s26 = sshll.u32 %s564_s25, 4  ;;  %s405_s2 = int_to_ptr.vmem [resolvable:$true] %s404_s2  ;;  %s393_s26 = int_to_ptr.vmem [resolvable:$true] %s392_s26 }
   0x5   :  { %s565_s27 = smov [#allocation6]   ;;  %s498_s29 = scalar_lea.vmem %s405_s2, 256 }
   0x6   :  { %v132_v30 = vadd.s32 8, %v131_v29  ;;  %vm135_vm4 = vcmp.eq.s32.totalorder %v131_v29, %v134_v31  ;;  %s416_s28 = sshll.u32 %s565_s27, 4  ;;  %p499_p0 = scmp.ne.s32.totalorder %s405_s2, %s498_s29  ;;  %s632_s28 = int_to_ptr.vmem [resolvable:$true] %s416_s28 }
   0x7   :  { %463 = vmatpush3.xpose.msk.msra.mxu0 %vm21_vm0, %v19_v1  ;;  %v438_v36 = vsel %vm135_vm4, 1.0, %v562_v32  ;;  %p503_p1 = scmp.lt.s32.totalorder %s405_s2, %s405_s2  ;;  %p504_p2 = scmp.lt.s32.totalorder %s498_s29, %s498_s29 }
   0x8   :  { %479 = vmatprep.subr.mxu0 %v308_v18  ;;  %vm136_vm3 = vcmp.eq.s32.totalorder %v132_v30, %v134_v31 }
   0x9   :  { %v439_v33 = vsel %vm136_vm3, 1.0, %v562_v32  ;;  %p505_p3 = por %p504_p2, %p503_p1 }
   0xa   :  { %465 = vmatmul.mubr.msk.f32.vlgmr.msra.gmra.mxu0 %vm21_vm0, %v20_v0 }
   0xb   :  { %481 = vmatprep.mubr.msk.f32.mxu0 %vm21_vm0, %v19_v1  ;;  %480 = vmatpush3.msra.mxu0 %v308_v18  ;;  %p506_p4 = pnand %p505_p3, %p499_p0 }
   0xe   :  { %482 = vmatmul.mubr.msk.f32.vlgmr.msra.gmra.mxu0 %vm21_vm0, %v20_v0 }
  0xca   :  { %v466_v2 = vpop.f32.mrf.mxu0 }
  0xcb   :  { %v104_v3 = vmax.f32 %v466_v2, 0.0 }
  0xcc   :  { %v94_v4 = vpop.f32.mrf.mxu0 }
  0xcd   :  { %v103_v5 = vmax.f32 %v94_v4, 0.0  ;;  %v109_v6 = vsel %vm105_vm1, %v104_v3, -inf }
  0xce   :  { %110 = vmax.xlane.f32.xlu0 %v109_v6  ;;  %v483_v26 = vpop.f32.mrf.mxu0 }
  0xcf   :  { %v106_v7 = vsel %vm105_vm1, %v103_v5, -inf  ;;  %386 = vst.msk [vmem:[#allocation6 + $0x8] sm:$0xff] %vm384_vm2, %v483_v26 }
  0xd0   :  { %v375_v27 = vpop.f32.mrf.mxu0 }
  0xd1   :  { %385 = vst.msk [vmem:[#allocation6] sm:$0xff] %vm384_vm2, %v375_v27 }
  0xd2   :  { %107 = vmax.xlane.f32.xlu0 %v106_v7 }
 0x157   :  { %v111_v8 = vpop.xlane.xlu0 %110 }
 0x158   :  { %v113_v9 = vsub.f32 %v104_v3, %v111_v8 }
 0x15a   :  { %v116_v10 = vmul.f32 1.442695, %v113_v9 }
 0x15b   :  { %v108_v11 = vpop.xlane.xlu0 %107 }
 0x15c   :  { %490 = vpow2.f32 %v116_v10  ;;  %v112_v12 = vsub.f32 %v103_v5, %v108_v11 }
 0x15e   :  { %v114_v13 = vmul.f32 1.442695, %v112_v12 }
 0x160   :  { %492 = vpow2.f32 %v114_v13 }
 0x169   :  { %v491_v14 = vpop.eup %490 }
 0x16a   :  { %v121_v15 = vsel %vm105_vm1, %v491_v14, 0.0 }
 0x16b   :  { %122 = vadd.xlane.f32.xlu1 %v121_v15 }
 0x16d   :  { %v493_v16 = vpop.eup %492 }
 0x16e   :  { %v118_v17 = vsel %vm105_vm1, %v493_v16, 0.0 }
 0x16f   :  { %119 = vadd.xlane.f32.xlu1 %v118_v17 }
 0x1f4   :  { %v123_v19 = vpop.xlane.xlu1 %122 }
 0x1f5   :  { %494 = vrcp.f32 %v123_v19 }
 0x1f8   :  { %v120_v20 = vpop.xlane.xlu1 %119 }
 0x1f9   :  { %496 = vrcp.f32 %v120_v20 }
 0x202   :  { %v495_v21 = vpop.eup %494 }
 0x203   :  { %v127_v22 = vmul.f32 %v495_v21, %v491_v14 }
 0x205   :  { %467 = vmatprep.subr.mxu1 %v127_v22  ;;  %129 = vst.msk [vmem:[#allocation2 + $0x8] sm:$0xff] %vm105_vm1, %v127_v22 }
 0x206   :  { %v497_v23 = vpop.eup %496  ;;  %468 = vmatpush3.msra.mxu1 %v127_v22 }
 0x207   :  { %v125_v24 = vmul.f32 %v497_v23, %v493_v16 }
 0x209   :  { %469 = vmatprep.subr.mxu1 %v125_v24  ;;  %128 = vst.msk [vmem:[#allocation2] sm:$0xff] %vm105_vm1, %v125_v24  ;;  %471 = vmatprep.mubr.msk.f32.mxu1 %vm105_vm1, %v125_v24 }
 0x20a   :  { %470 = vmatpush3.msra.mxu1 %v125_v24 }
 0x20b   :  { %472 = vmatmul.mubr.msk.f32.vlgmr.msra.gmra.mxu1 %vm105_vm1, %v127_v22  ;;  %474 = vmatprep.subr.mxu1 %v229_v25 }
 0x20c   :  { %475 = vmatpush3.msra.mxu1 %v229_v25  ;;  %476 = vmatprep.mubr.msk.f32.mxu1 %vm21_vm0, %v19_v1 }
 0x20f   :  { %477 = vmatmul.mubr.msk.f32.vlgmr.msra.gmra.mxu1 %vm21_vm0, %v20_v0 }
 0x2cb   :  { %v473_v34 = vpop.f32.mrf.mxu1 }
 0x2cc   :  { %v223_v35 = vmul.f32 2.0, %v473_v34 }
 0x2cd   :  { %v213_v37 = vpop.f32.mrf.mxu1 }
 0x2ce   :  { %v225_v38 = vsub.f32 %v223_v35, %v439_v33  ;;  %v222_v39 = vmul.f32 2.0, %v213_v37 }
 0x2cf   :  { %v478_v40 = vpop.f32.mrf.mxu1 }
 0x2d0   :  { %228 = vst.msk [vmem:[#allocation2 + $0x18] sm:$0xff] %vm105_vm1, %v225_v38  ;;  %v224_v41 = vsub.f32 %v222_v39, %v438_v36 }
 0x2d1   :  { %307 = vst.msk [vmem:[#allocation4 + $0x8] sm:$0xff] %vm305_vm5, %v478_v40  ;;  %v296_v42 = vpop.f32.mrf.mxu1 }
 0x2d2   :  { %227 = vst.msk [vmem:[#allocation2 + $0x10] sm:$0xff] %vm105_vm1, %v224_v41 }
 0x2d3   :  { %306 = vst.msk [vmem:[#allocation4] sm:$0xff] %vm305_vm5, %v296_v42 }
 0x2d4   :  { %509 = shalt.err (!%p506_p4)
}
 0x2d5   :  { %s566_s30 = smov 128   ;;  %s567_s6 = smov 8  }
 0x2d6   :  { %410 = dma.vmem_to_hbm [thread:$0]  %s405_s2, 256, %s652_s4, [#allocation5], %s566_s30, %s566_s30, %s567_s6  }
 0x2d7   :  { %s518_s9 = scalar_lea.vmem %s393_s26, 512  ;;  %p523_p6 = scmp.lt.s32.totalorder %s393_s26, %s393_s26 }
 0x2d8   :  { %p519_p5 = scmp.ne.s32.totalorder %s393_s26, %s518_s9  ;;  %p524_p7 = scmp.lt.s32.totalorder %s518_s9, %s518_s9 }
 0x2da   :  { %p525_p8 = por %p524_p7, %p523_p6 }
 0x2dc   :  { %p526_p9 = pnand %p525_p8, %p519_p5 }
 0x2de   :  { %529 = shalt.err (!%p526_p9)
}
 0x2df   :  { %398 = dma.vmem_to_hbm [thread:$0]  %s393_s26, 512, %s651_s3, [#allocation3], %s566_s30, %s566_s30, %s567_s6  }
 0x2e0   :  { %s538_s12 = scalar_lea.vmem %s632_s28, 256  ;;  %p543_p11 = scmp.lt.s32.totalorder %s632_s28, %s632_s28 }
 0x2e1   :  { %p539_p10 = scmp.ne.s32.totalorder %s632_s28, %s538_s12  ;;  %p544_p12 = scmp.lt.s32.totalorder %s538_s12, %s538_s12 }
 0x2e3   :  { %p545_p13 = por %p544_p12, %p543_p11 }
 0x2e5   :  { %p546_p0 = pnand %p545_p13, %p539_p10 }
 0x2e7   :  { %549 = shalt.err (!%p546_p0)
}
 0x2e8   :  { %422 = dma.vmem_to_hbm [thread:$0]  %s632_s28, 256, %s653_s5, [#allocation5], %s566_s30, %s566_s30, %s567_s6  }
 0x2e9   :  { %558 = dma.done.wait [#allocation3], 512  }
 0x2ea   :  { %559 = vsyncadd [#allocation3], 4294966784 }
 0x2eb   :  { %560 = dma.done.wait [#allocation5], 512  }
 0x2ec   :  { %561 = vsyncadd [#allocation5], 4294966784 }
 0x2ed   :  { %432 = vsyncpa [#allocation3], 1 }
 0x2ee   :  { %433 = vsyncpa [#allocation5], 1 }

</bundles_post_ra>
